<compile_context>
chip_gen: v6e
topology: v6e:2x2x1
jax: 0.10.0
libtpu: 0.0.40
codegen_flags: <defaults>
</compile_context>

<pallas_src>
import functools
import itertools

import jax
import jax.numpy as jnp
from jax.experimental import pallas as pl
from jax.experimental.pallas import tpu as pltpu

EPSILON = 1e-6
SIGMA_BOOST = 2.0

RANK = 2                      # weights_rank = in_rank(1) + len(out_shape)(1)
NUM_NEIGH = 2 ** RANK
FLOOR_MASK = list(itertools.product([True, False], repeat=RANK))


def _sigmoid(x):
    return 1.0 / (1.0 + jnp.exp(-x))


def _softplus(x):
    # numerically stable log(1 + exp(x))
    return jnp.maximum(x, 0.0) + jnp.log(1.0 + jnp.exp(-jnp.abs(x)))


def hyperlayer_kernel(x_ref, wh_ref, bh_ref, bias_ref, y_ref, *,
                      k, cin, cout, block_b, mxu_dtype):
    x = x_ref[...]                                                    # (block_b, Cin) f32

    # --- hypernetwork matmul for the whole row-block (MXU) ---
    res = jnp.dot(x.astype(mxu_dtype), wh_ref[...].astype(mxu_dtype),
                  preferred_element_type=jnp.float32) + bh_ref[...]   # (block_b, M)

    # --- split_out, batched over the block ---
    means_o = _sigmoid(res[:, 0:k]) * (float(cout) - 1.0)             # (block_b, k)
    means_i = _sigmoid(res[:, k:2 * k]) * (float(cin) - 1.0)          # (block_b, k)
    sig = _softplus(res[:, 2 * k:3 * k] + SIGMA_BOOST) + EPSILON      # (block_b, k)
    sig_o = sig * float(cout)
    sig_i = sig * float(cin)
    vals = res[:, 3 * k:4 * k]                                        # (block_b, k)

    # --- discretize (additional = 0): floor/ceil neighbours + densities.
    # floor/ceil and the per-rank squared-distance terms are computed once and
    # reused by all 2^RANK neighbours (no redundant floor/ceil/div per mask).
    fl_o = jnp.floor(means_o); ce_o = jnp.ceil(means_o)
    fl_i = jnp.floor(means_i); ce_i = jnp.ceil(means_i)

    def d2(nb, mu, s):
        d = nb - mu
        return d * d / (EPSILON + s)

    d2_fl_o = d2(fl_o, means_o, sig_o); d2_ce_o = d2(ce_o, means_o, sig_o)
    d2_fl_i = d2(fl_i, means_i, sig_i); d2_ce_i = d2(ce_i, means_i, sig_i)

    # FLOOR_MASK order: (floor,floor), (floor,ceil), (ceil,floor), (ceil,ceil)
    dens = [jnp.exp(-0.5 * (d2_fl_o + d2_fl_i)),
            jnp.exp(-0.5 * (d2_fl_o + d2_ce_i)),
            jnp.exp(-0.5 * (d2_ce_o + d2_fl_i)),
            jnp.exp(-0.5 * (d2_ce_o + d2_ce_i))]
    denom = dens[0] + dens[1] + dens[2] + dens[3] + float(NUM_NEIGH) * EPSILON
    inv_denom = pl.reciprocal(denom, approx=True)     # EUP slot, ~1e-4 rel err
    vd = vals * inv_denom

    # Concatenate the 4 neighbours along k: everything below is (block_b, 4k).
    w_cat = jnp.concatenate([vd * dens[0], vd * dens[1],
                             vd * dens[2], vd * dens[3]], axis=1)
    out_cat = jnp.concatenate([fl_o, fl_o, ce_o, ce_o], axis=1).astype(jnp.int32)
    in_cat = jnp.concatenate([fl_i, ce_i, fl_i, ce_i], axis=1).astype(jnp.int32)

    nk = NUM_NEIGH * k
    iota_in = jax.lax.broadcasted_iota(jnp.int32, (cin, nk), 0)       # hoisted
    iota_out = jax.lax.broadcasted_iota(jnp.int32, (cout, nk), 0)     # hoisted

    # --- sparse multiply: y[b,o] += w * x[b,i] as 2 one-hot matmuls per row ---
    rows = []
    for b in range(block_b):          # only the index-dependent part is per-row
        gather_oh = (iota_in == in_cat[b:b + 1, :]).astype(mxu_dtype)      # (Cin, 4k)
        xg = jnp.dot(x[b:b + 1, :].astype(mxu_dtype), gather_oh,
                     preferred_element_type=jnp.float32)                   # (1, 4k)
        scatter_oh = (iota_out == out_cat[b:b + 1, :]).astype(mxu_dtype)   # (Cout, 4k)
        rows.append(jax.lax.dot_general(
            (w_cat[b:b + 1, :] * xg).astype(mxu_dtype), scatter_oh,
            (((1,), (1,)), ((), ())),
            preferred_element_type=jnp.float32))                           # (1, Cout)
    y = rows[0] if block_b == 1 else jnp.concatenate(rows, axis=0)         # (block_b, Cout)

    # Bias added once for the block; single store of the whole output block.
    y_ref[...] = y + bias_ref[...]


def hyperlayer_forward(x, wh, bh, bias, *, k, cout, block_b=None,
                       mxu_dtype=jnp.float32):
    """mxu_dtype=jnp.bfloat16 uses the fast bf16 MXU path (v6e/v7x); note that
    rounding x/wh in the hypernet matmul can, in rare borderline cases, flip a
    floor/ceil neighbour choice relative to the f32 reference."""
    B, Cin = x.shape
    M = wh.shape[1]
    if block_b is None:
        # Small static row-block per grid step (unrolled in-kernel).
        block_b = B if B <= 8 else 8
    assert B % block_b == 0, "batch must be divisible by the row block"
    grid_b = pl.cdiv(B, block_b)

    kernel = functools.partial(hyperlayer_kernel, k=k, cin=Cin, cout=cout,
                               block_b=block_b, mxu_dtype=mxu_dtype)
    return pl.pallas_call(
        kernel,
        out_shape=jax.ShapeDtypeStruct((B, cout), jnp.float32),
        grid=(grid_b,),
        in_specs=[
            pl.BlockSpec((block_b, Cin), lambda i: (i, 0)),   # x: tiled over batch
            pl.BlockSpec((Cin, M), lambda i: (0, 0)),         # wh: resident across steps
            pl.BlockSpec((1, M), lambda i: (0, 0)),           # bh: resident
            pl.BlockSpec((1, cout), lambda i: (0, 0)),        # bias: resident
        ],
        out_specs=pl.BlockSpec((block_b, cout), lambda i: (i, 0)),
        compiler_params=pltpu.CompilerParams(
            dimension_semantics=("parallel",)),               # megacore on v7x
    )(x, wh, bh, bias)


def reference_forward(x, wh, bh, bias, *, k, cout):
    """Pure-JAX reference, directly mirroring the PyTorch forward_inner path."""
    B, Cin = x.shape
    sizes = jnp.array([cout, Cin], jnp.float32)
    res = x @ wh + bh[0]                                             # (B, M)
    res3 = jnp.stack([res[:, j * k:(j + 1) * k] for j in range(RANK + 2)], axis=2)  # (B,k,RANK+2)
    means = _sigmoid(res3[:, :, :RANK]) * (sizes - 1.0)              # (B,k,RANK)
    sigmas = (_softplus(res3[:, :, RANK] + SIGMA_BOOST) + EPSILON)[:, :, None] * sizes
    values = res3[:, :, RANK + 1]                                    # (B,k)
    fm = jnp.array([[1.0 if bo else 0.0 for bo in bools] for bools in FLOOR_MASK])  # (4,RANK)
    neigh = jnp.where(fm[None, None] > 0.5,
                      jnp.floor(means)[:, :, None, :],
                      jnp.ceil(means)[:, :, None, :])                # (B,k,4,RANK)
    diff = neigh - means[:, :, None, :]
    prods = jnp.sum(diff * diff / (EPSILON + sigmas[:, :, None, :]), axis=-1)
    dens = jnp.exp(-0.5 * prods)                                     # (B,k,4)
    props = dens / jnp.sum(dens + EPSILON, axis=2, keepdims=True)
    w = (values[:, :, None] * props).reshape(B, -1)
    out_i = neigh[..., 0].astype(jnp.int32).reshape(B, -1)
    in_i = neigh[..., 1].astype(jnp.int32).reshape(B, -1)

    def per_batch(xb, oi, ii, wb):
        return jnp.zeros((cout,), jnp.float32).at[oi].add(wb * xb[ii])

    return jax.vmap(per_batch)(x, out_i, in_i, w) + bias[0]


if __name__ == "__main__":
    B, CIN, COUT, K = 2, 32, 16, 8
    M = K * (RANK + 2)

    key = jax.random.PRNGKey(0)
    kx, kw, kb, kbias = jax.random.split(key, 4)
    x = jax.random.normal(kx, (B, CIN), jnp.float32)
    wh = jax.random.normal(kw, (CIN, M), jnp.float32) / jnp.sqrt(float(CIN))
    bh = jax.random.normal(kb, (1, M), jnp.float32) * 0.1
    bias = jax.random.normal(kbias, (1, COUT), jnp.float32) * 0.1

    y = hyperlayer_forward(x, wh, bh, bias, k=K, cout=COUT)
    y = jax.block_until_ready(y)

    y_ref = reference_forward(x, wh, bh, bias, k=K, cout=COUT)
    # 2e-3 tolerance: the kernel uses the EUP approximate reciprocal (~1e-4
    # relative error) for the density normalisation; everything else is f32.
    if not bool(jnp.allclose(y, y_ref, atol=2e-3, rtol=2e-3)):
        raise AssertionError(
            f"mismatch: max abs err {float(jnp.max(jnp.abs(y - y_ref)))}")
    print("KERNEL_OK")
</pallas_src>

<mosaic_0001>
module attributes {stable_mosaic.version = 11 : i64} {
  func.func @hyperlayer_kernel(%arg0: i32, %arg1: memref<2x32xf32, #tpu.memory_space<vmem>>, %arg2: memref<32x32xf32, #tpu.memory_space<vmem>>, %arg3: memref<1x32xf32, #tpu.memory_space<vmem>>, %arg4: memref<1x16xf32, #tpu.memory_space<vmem>>, %arg5: memref<2x16xf32, #tpu.memory_space<vmem>>) attributes {dimension_semantics = [#tpu.dimension_semantics<parallel>], iteration_bounds = array<i64: 1>, scalar_prefetch = 0 : i64, scratch_operands = 0 : i64, tpu.core_type = #tpu.core_type<tc>, window_params = [{transform_indices = @transform_0, window_bounds = array<i64: 2, 32>}, {pipeline_mode = #tpu.pipeline_mode<synchronous>, transform_indices = @transform_1, window_bounds = array<i64: 32, 32>}, {pipeline_mode = #tpu.pipeline_mode<synchronous>, transform_indices = @transform_2, window_bounds = array<i64: 1, 32>}, {pipeline_mode = #tpu.pipeline_mode<synchronous>, transform_indices = @transform_3, window_bounds = array<i64: 1, 16>}, {transform_indices = @transform_4, window_bounds = array<i64: 2, 16>}]} {
    %c0 = arith.constant 0 : index
    %c0_0 = arith.constant 0 : index
    %0 = vector.load %arg1[%c0, %c0_0] : memref<2x32xf32, #tpu.memory_space<vmem>>, vector<2x32xf32>
    %c0_1 = arith.constant 0 : index
    %c0_2 = arith.constant 0 : index
    %1 = vector.load %arg2[%c0_1, %c0_2] : memref<32x32xf32, #tpu.memory_space<vmem>>, vector<32x32xf32>
    %cst = arith.constant dense<0.000000e+00> : vector<2x32xf32>
    %2 = tpu.matmul %0, %1, %cst {dimension_numbers = #tpu.dot_dimension_numbers<[1], [0], [0], [1], [0, 0, 1, 1], [], []>} : vector<2x32xf32>, vector<32x32xf32>, vector<2x32xf32> -> vector<2x32xf32>
    %c0_3 = arith.constant 0 : index
    %c0_4 = arith.constant 0 : index
    %3 = vector.load %arg3[%c0_3, %c0_4] : memref<1x32xf32, #tpu.memory_space<vmem>>, vector<1x32xf32>
    %4 = vector.broadcast %3 : vector<1x32xf32> to vector<2x32xf32>
    %5 = arith.addf %2, %4 : vector<2x32xf32>
    %6 = vector.extract_strided_slice %5 {offsets = [0, 0], sizes = [2, 8], strides = [1, 1]} : vector<2x32xf32> to vector<2x8xf32>
    %cst_5 = arith.constant 0.000000e+00 : f32
    %7 = vector.broadcast %cst_5 : f32 to vector<2x8xf32>
    %8 = arith.subf %7, %6 : vector<2x8xf32>
    %9 = math.exp %8 : vector<2x8xf32>
    %cst_6 = arith.constant 1.000000e+00 : f32
    %10 = vector.broadcast %cst_6 : f32 to vector<2x8xf32>
    %11 = arith.addf %10, %9 : vector<2x8xf32>
    %cst_7 = arith.constant 1.000000e+00 : f32
    %12 = vector.broadcast %cst_7 : f32 to vector<2x8xf32>
    %13 = arith.divf %12, %11 : vector<2x8xf32>
    %cst_8 = arith.constant 1.500000e+01 : f32
    %14 = vector.broadcast %cst_8 : f32 to vector<2x8xf32>
    %15 = arith.mulf %13, %14 : vector<2x8xf32>
    %16 = vector.extract_strided_slice %5 {offsets = [0, 8], sizes = [2, 8], strides = [1, 1]} : vector<2x32xf32> to vector<2x8xf32>
    %cst_9 = arith.constant 0.000000e+00 : f32
    %17 = vector.broadcast %cst_9 : f32 to vector<2x8xf32>
    %18 = arith.subf %17, %16 : vector<2x8xf32>
    %19 = math.exp %18 : vector<2x8xf32>
    %cst_10 = arith.constant 1.000000e+00 : f32
    %20 = vector.broadcast %cst_10 : f32 to vector<2x8xf32>
    %21 = arith.addf %20, %19 : vector<2x8xf32>
    %cst_11 = arith.constant 1.000000e+00 : f32
    %22 = vector.broadcast %cst_11 : f32 to vector<2x8xf32>
    %23 = arith.divf %22, %21 : vector<2x8xf32>
    %cst_12 = arith.constant 3.100000e+01 : f32
    %24 = vector.broadcast %cst_12 : f32 to vector<2x8xf32>
    %25 = arith.mulf %23, %24 : vector<2x8xf32>
    %26 = vector.extract_strided_slice %5 {offsets = [0, 16], sizes = [2, 8], strides = [1, 1]} : vector<2x32xf32> to vector<2x8xf32>
    %cst_13 = arith.constant 2.000000e+00 : f32
    %27 = vector.broadcast %cst_13 : f32 to vector<2x8xf32>
    %28 = arith.addf %26, %27 : vector<2x8xf32>
    %cst_14 = arith.constant 0.000000e+00 : f32
    %29 = vector.broadcast %cst_14 : f32 to vector<2x8xf32>
    %30 = arith.maximumf %28, %29 : vector<2x8xf32>
    %31 = math.absf %28 : vector<2x8xf32>
    %cst_15 = arith.constant 0.000000e+00 : f32
    %32 = vector.broadcast %cst_15 : f32 to vector<2x8xf32>
    %33 = arith.subf %32, %31 : vector<2x8xf32>
    %34 = math.exp %33 : vector<2x8xf32>
    %cst_16 = arith.constant 1.000000e+00 : f32
    %35 = vector.broadcast %cst_16 : f32 to vector<2x8xf32>
    %36 = arith.addf %35, %34 : vector<2x8xf32>
    %37 = math.log %36 : vector<2x8xf32>
    %38 = arith.addf %30, %37 : vector<2x8xf32>
    %cst_17 = arith.constant 9.99999997E-7 : f32
    %39 = vector.broadcast %cst_17 : f32 to vector<2x8xf32>
    %40 = arith.addf %38, %39 : vector<2x8xf32>
    %cst_18 = arith.constant 1.600000e+01 : f32
    %41 = vector.broadcast %cst_18 : f32 to vector<2x8xf32>
    %42 = arith.mulf %40, %41 : vector<2x8xf32>
    %cst_19 = arith.constant 3.200000e+01 : f32
    %43 = vector.broadcast %cst_19 : f32 to vector<2x8xf32>
    %44 = arith.mulf %40, %43 : vector<2x8xf32>
    %45 = vector.extract_strided_slice %5 {offsets = [0, 24], sizes = [2, 8], strides = [1, 1]} : vector<2x32xf32> to vector<2x8xf32>
    %46 = math.floor %15 : vector<2x8xf32>
    %47 = math.ceil %15 : vector<2x8xf32>
    %48 = math.floor %25 : vector<2x8xf32>
    %49 = math.ceil %25 : vector<2x8xf32>
    %50 = arith.subf %46, %15 : vector<2x8xf32>
    %51 = arith.mulf %50, %50 : vector<2x8xf32>
    %cst_20 = arith.constant 9.99999997E-7 : f32
    %52 = vector.broadcast %cst_20 : f32 to vector<2x8xf32>
    %53 = arith.addf %52, %42 : vector<2x8xf32>
    %54 = arith.divf %51, %53 : vector<2x8xf32>
    %55 = arith.subf %47, %15 : vector<2x8xf32>
    %56 = arith.mulf %55, %55 : vector<2x8xf32>
    %cst_21 = arith.constant 9.99999997E-7 : f32
    %57 = vector.broadcast %cst_21 : f32 to vector<2x8xf32>
    %58 = arith.addf %57, %42 : vector<2x8xf32>
    %59 = arith.divf %56, %58 : vector<2x8xf32>
    %60 = arith.subf %48, %25 : vector<2x8xf32>
    %61 = arith.mulf %60, %60 : vector<2x8xf32>
    %cst_22 = arith.constant 9.99999997E-7 : f32
    %62 = vector.broadcast %cst_22 : f32 to vector<2x8xf32>
    %63 = arith.addf %62, %44 : vector<2x8xf32>
    %64 = arith.divf %61, %63 : vector<2x8xf32>
    %65 = arith.subf %49, %25 : vector<2x8xf32>
    %66 = arith.mulf %65, %65 : vector<2x8xf32>
    %cst_23 = arith.constant 9.99999997E-7 : f32
    %67 = vector.broadcast %cst_23 : f32 to vector<2x8xf32>
    %68 = arith.addf %67, %44 : vector<2x8xf32>
    %69 = arith.divf %66, %68 : vector<2x8xf32>
    %70 = arith.addf %54, %64 : vector<2x8xf32>
    %cst_24 = arith.constant -5.000000e-01 : f32
    %71 = vector.broadcast %cst_24 : f32 to vector<2x8xf32>
    %72 = arith.mulf %71, %70 : vector<2x8xf32>
    %73 = math.exp %72 : vector<2x8xf32>
    %74 = arith.addf %54, %69 : vector<2x8xf32>
    %cst_25 = arith.constant -5.000000e-01 : f32
    %75 = vector.broadcast %cst_25 : f32 to vector<2x8xf32>
    %76 = arith.mulf %75, %74 : vector<2x8xf32>
    %77 = math.exp %76 : vector<2x8xf32>
    %78 = arith.addf %59, %64 : vector<2x8xf32>
    %cst_26 = arith.constant -5.000000e-01 : f32
    %79 = vector.broadcast %cst_26 : f32 to vector<2x8xf32>
    %80 = arith.mulf %79, %78 : vector<2x8xf32>
    %81 = math.exp %80 : vector<2x8xf32>
    %82 = arith.addf %59, %69 : vector<2x8xf32>
    %cst_27 = arith.constant -5.000000e-01 : f32
    %83 = vector.broadcast %cst_27 : f32 to vector<2x8xf32>
    %84 = arith.mulf %83, %82 : vector<2x8xf32>
    %85 = math.exp %84 : vector<2x8xf32>
    %86 = arith.addf %73, %77 : vector<2x8xf32>
    %87 = arith.addf %86, %81 : vector<2x8xf32>
    %88 = arith.addf %87, %85 : vector<2x8xf32>
    %cst_28 = arith.constant 4.000000e-06 : f32
    %89 = vector.broadcast %cst_28 : f32 to vector<2x8xf32>
    %90 = arith.addf %88, %89 : vector<2x8xf32>
    %91 = tpu.reciprocal %90 {approx = true} : vector<2x8xf32> -> vector<2x8xf32>
    %92 = arith.mulf %45, %91 : vector<2x8xf32>
    %93 = arith.mulf %92, %73 : vector<2x8xf32>
    %94 = arith.mulf %92, %77 : vector<2x8xf32>
    %95 = arith.mulf %92, %81 : vector<2x8xf32>
    %96 = arith.mulf %92, %85 : vector<2x8xf32>
    %97 = tpu.concatenate %93, %94, %95, %96 in 1 : vector<2x8xf32>, vector<2x8xf32>, vector<2x8xf32>, vector<2x8xf32> -> vector<2x32xf32>
    %98 = tpu.concatenate %46, %46, %47, %47 in 1 : vector<2x8xf32>, vector<2x8xf32>, vector<2x8xf32>, vector<2x8xf32> -> vector<2x32xf32>
    %99 = arith.fptosi %98 : vector<2x32xf32> to vector<2x32xi32>
    %100 = tpu.concatenate %48, %49, %48, %49 in 1 : vector<2x8xf32>, vector<2x8xf32>, vector<2x8xf32>, vector<2x8xf32> -> vector<2x32xf32>
    %101 = arith.fptosi %100 : vector<2x32xf32> to vector<2x32xi32>
    %102 = tpu.iota {dimensions = array<i32: 0>} : vector<32x32xi32>
    %103 = tpu.iota {dimensions = array<i32: 0>} : vector<16x32xi32>
    %104 = vector.extract_strided_slice %101 {offsets = [0, 0], sizes = [1, 32], strides = [1, 1]} : vector<2x32xi32> to vector<1x32xi32>
    %105 = vector.broadcast %104 : vector<1x32xi32> to vector<32x32xi32>
    %106 = arith.cmpi eq, %102, %105 : vector<32x32xi32>
    %107 = arith.extui %106 : vector<32x32xi1> to vector<32x32xi32>
    %108 = arith.sitofp %107 : vector<32x32xi32> to vector<32x32xf32>
    %109 = vector.extract_strided_slice %0 {offsets = [0, 0], sizes = [1, 32], strides = [1, 1]} : vector<2x32xf32> to vector<1x32xf32>
    %cst_29 = arith.constant dense<0.000000e+00> : vector<1x32xf32>
    %110 = tpu.matmul %109, %108, %cst_29 {dimension_numbers = #tpu.dot_dimension_numbers<[1], [0], [0], [1], [0, 0, 1, 1], [], []>} : vector<1x32xf32>, vector<32x32xf32>, vector<1x32xf32> -> vector<1x32xf32>
    %111 = vector.extract_strided_slice %99 {offsets = [0, 0], sizes = [1, 32], strides = [1, 1]} : vector<2x32xi32> to vector<1x32xi32>
    %112 = vector.broadcast %111 : vector<1x32xi32> to vector<16x32xi32>
    %113 = arith.cmpi eq, %103, %112 : vector<16x32xi32>
    %114 = arith.extui %113 : vector<16x32xi1> to vector<16x32xi32>
    %115 = arith.sitofp %114 : vector<16x32xi32> to vector<16x32xf32>
    %116 = vector.extract_strided_slice %97 {offsets = [0, 0], sizes = [1, 32], strides = [1, 1]} : vector<2x32xf32> to vector<1x32xf32>
    %117 = arith.mulf %116, %110 : vector<1x32xf32>
    %cst_30 = arith.constant dense<0.000000e+00> : vector<1x16xf32>
    %118 = tpu.matmul %117, %115, %cst_30 {dimension_numbers = #tpu.dot_dimension_numbers<[1], [1], [0], [0], [0, 0, 1, 0], [], []>} : vector<1x32xf32>, vector<16x32xf32>, vector<1x16xf32> -> vector<1x16xf32>
    %119 = vector.extract_strided_slice %101 {offsets = [1, 0], sizes = [1, 32], strides = [1, 1]} : vector<2x32xi32> to vector<1x32xi32>
    %120 = vector.broadcast %119 : vector<1x32xi32> to vector<32x32xi32>
    %121 = arith.cmpi eq, %102, %120 : vector<32x32xi32>
    %122 = arith.extui %121 : vector<32x32xi1> to vector<32x32xi32>
    %123 = arith.sitofp %122 : vector<32x32xi32> to vector<32x32xf32>
    %124 = vector.extract_strided_slice %0 {offsets = [1, 0], sizes = [1, 32], strides = [1, 1]} : vector<2x32xf32> to vector<1x32xf32>
    %cst_31 = arith.constant dense<0.000000e+00> : vector<1x32xf32>
    %125 = tpu.matmul %124, %123, %cst_31 {dimension_numbers = #tpu.dot_dimension_numbers<[1], [0], [0], [1], [0, 0, 1, 1], [], []>} : vector<1x32xf32>, vector<32x32xf32>, vector<1x32xf32> -> vector<1x32xf32>
    %126 = vector.extract_strided_slice %99 {offsets = [1, 0], sizes = [1, 32], strides = [1, 1]} : vector<2x32xi32> to vector<1x32xi32>
    %127 = vector.broadcast %126 : vector<1x32xi32> to vector<16x32xi32>
    %128 = arith.cmpi eq, %103, %127 : vector<16x32xi32>
    %129 = arith.extui %128 : vector<16x32xi1> to vector<16x32xi32>
    %130 = arith.sitofp %129 : vector<16x32xi32> to vector<16x32xf32>
    %131 = vector.extract_strided_slice %97 {offsets = [1, 0], sizes = [1, 32], strides = [1, 1]} : vector<2x32xf32> to vector<1x32xf32>
    %132 = arith.mulf %131, %125 : vector<1x32xf32>
    %cst_32 = arith.constant dense<0.000000e+00> : vector<1x16xf32>
    %133 = tpu.matmul %132, %130, %cst_32 {dimension_numbers = #tpu.dot_dimension_numbers<[1], [1], [0], [0], [0, 0, 1, 0], [], []>} : vector<1x32xf32>, vector<16x32xf32>, vector<1x16xf32> -> vector<1x16xf32>
    %134 = tpu.concatenate %118, %133 in 0 : vector<1x16xf32>, vector<1x16xf32> -> vector<2x16xf32>
    %c0_33 = arith.constant 0 : index
    %c0_34 = arith.constant 0 : index
    %135 = vector.load %arg4[%c0_33, %c0_34] : memref<1x16xf32, #tpu.memory_space<vmem>>, vector<1x16xf32>
    %136 = vector.broadcast %135 : vector<1x16xf32> to vector<2x16xf32>
    %137 = arith.addf %134, %136 : vector<2x16xf32>
    %c0_35 = arith.constant 0 : index
    %c0_36 = arith.constant 0 : index
    %138 = vector.load %arg5[%c0_35, %c0_36] : memref<2x16xf32, #tpu.memory_space<vmem>>, vector<2x16xf32>
    tpu.vector_store %arg5[%c0_35, %c0_36], %137 {strides = array<i32>} : memref<2x16xf32, #tpu.memory_space<vmem>>, vector<2x16xf32>,
    return
  }
  func.func @transform_0(%arg0: i32) -> (i32, i32) {
    %c0_i32 = arith.constant 0 : i32
    %c0_i32_0 = arith.constant 0 : i32
    return %arg0, %c0_i32 : i32, i32
  }
  func.func @transform_1(%arg0: i32) -> (i32, i32) {
    %c0_i32 = arith.constant 0 : i32
    %c0_i32_0 = arith.constant 0 : i32
    %c0_i32_1 = arith.constant 0 : i32
    return %c0_i32, %c0_i32_0 : i32, i32
  }
  func.func @transform_2(%arg0: i32) -> (i32, i32) {
    %c0_i32 = arith.constant 0 : i32
    %c0_i32_0 = arith.constant 0 : i32
    %c0_i32_1 = arith.constant 0 : i32
    return %c0_i32, %c0_i32_0 : i32, i32
  }
  func.func @transform_3(%arg0: i32) -> (i32, i32) {
    %c0_i32 = arith.constant 0 : i32
    %c0_i32_0 = arith.constant 0 : i32
    %c0_i32_1 = arith.constant 0 : i32
    return %c0_i32, %c0_i32_0 : i32, i32
  }
  func.func @transform_4(%arg0: i32) -> (i32, i32) {
    %c0_i32 = arith.constant 0 : i32
    %c0_i32_0 = arith.constant 0 : i32
    return %arg0, %c0_i32 : i32, i32
  }
}

</mosaic_0001>

<bundles_post_ra>
// kernel: tpu_custom_call.1
= control target key start
LH: loop header
LB: loop body
LE: loop exit
PB: predicated region body
PF: predicated region fallthrough
CT: control target
= control target key end

     0   :  { %9 = vsyncpa [#allocation3], 0  ;;  %s1037_s0 = inlined_call_operand.hbm [shape: f32[2,32], index: 0, kind: input, shape index: {}]   ;;  %s1038_s1 = inlined_call_operand.hbm [shape: f32[32,32], index: 1, kind: input, shape index: {}]   ;;  %s1039_s2 = inlined_call_operand.vmem [shape: f32[1,32], index: 2, kind: input, shape index: {}]   ;;  %s1040_s3 = inlined_call_operand.vmem [shape: f32[1,16], index: 3, kind: input, shape index: {}]   ;;  %s1041_s4 = inlined_call_operand.hbm [shape: f32[2,16], index: 4, kind: output, shape index: {}]  }
   0x1   :  { %10 = vsyncpa [#allocation6], 0 }
   0x2   :  { %11 = vsyncpa [#allocation4], 0  ;;  %s880_s15 = smov [#allocation2]   ;;  %s881_s17 = smov [#allocation5]  }
   0x3   :  { %s18_s16 = sshll.u32 %s880_s15, 4  ;;  %s27_s18 = sshll.u32 %s881_s17, 4  ;;  %s19_s16 = int_to_ptr.vmem [resolvable:$true] %s18_s16  ;;  %s28_s18 = int_to_ptr.vmem [resolvable:$true] %s27_s18 }
   0x4   :  { %s822_s19 = scalar_lea.vmem %s19_s16, 32  ;;  %p827_p1 = scmp.lt.s32.totalorder %s19_s16, %s19_s16 }
   0x5   :  { %p823_p0 = scmp.ne.s32.totalorder %s19_s16, %s822_s19  ;;  %p828_p2 = scmp.lt.s32.totalorder %s822_s19, %s822_s19 }
   0x7   :  { %p829_p3 = por %p828_p2, %p827_p1 }
   0x9   :  { %p830_p4 = pnand %p829_p3, %p823_p0 }
   0xb   :  { %833 = shalt.err (!%p830_p4)
}
   0xc   :  { %21 = dma.hbm_to_vmem [thread:$0]  %s1037_s0, 32, %s19_s16, [#allocation3]  }
   0xd   :  { %s842_s22 = scalar_lea.vmem %s28_s18, 512  ;;  %p847_p6 = scmp.lt.s32.totalorder %s28_s18, %s28_s18 }
   0xe   :  { %p843_p5 = scmp.ne.s32.totalorder %s28_s18, %s842_s22  ;;  %p848_p7 = scmp.lt.s32.totalorder %s842_s22, %s842_s22 }
  0x10   :  { %p849_p8 = por %p848_p7, %p847_p6 }
  0x12   :  { %p850_p9 = pnand %p849_p8, %p843_p5 }
  0x14   :  { %853 = shalt.err (!%p850_p9)
}
  0x15   :  { %s882_s23 = smov 128   ;;  %s883_s24 = smov 8  }
  0x16   :  { %33 = dma.hbm_to_vmem [thread:$0]  %s1038_s1, 512, %s28_s18, [#allocation6], %s882_s23, %s882_s23, %s883_s24  }
  0x17   :  { %874 = dma.done.wait [#allocation3], 32  }
  0x18   :  { %875 = vsyncadd [#allocation3], 4294967264 }
  0x19   :  { %876 = dma.done.wait [#allocation6], 512  }
  0x1a   :  { %877 = vsyncadd [#allocation6], 4294966784  ;;  %v884_v0 = vmov 0.0   ;;  %vm885_vm0 = vmmov 0   ;;  %v48_v1 = vld [vmem:[#allocation5 + $0x18] sm:$0xff]  ;;  %v47_v2 = vld [vmem:[#allocation5 + $0x10] sm:$0xff]  ;;  %v281_v36 = vlaneseq }
  0x1b   :  { %728 = vmatprep.subr.mxu0 %v884_v0  ;;  %736 = vmatprep.mubr.msk.f32.mxu0 %vm885_vm0, %v884_v0  ;;  %v46_v3 = vld [vmem:[#allocation5 + $0x8] sm:$0xff]  ;;  %v45_v4 = vld [vmem:[#allocation5] sm:$0xff]  ;;  %v933_v5 = vld [vmem:[#allocation2] sm:$0x3]  ;;  %vm56_vm1 = vcmask 261120   ;;  %s887_s27 = smov 120  }
  0x1c   :  { %739 = vmatprep.subr.mxu1 %v884_v0  ;;  %747 = vmatprep.mubr.msk.f32.mxu1 %vm885_vm0, %v884_v0  ;;  %v676_v6 = vld [vmem:[%s1039_s2] ss:$0 sm:$0xff]  ;;  %s886_s2 = smov 16   ;;  %s888_s28 = smov 112   ;;  %vm245_vm2 = vcmask 64512   ;;  %vm247_vm3 = vcmask 130048  }
  0x1d   :  { %729 = vmatpush3.msra.mxu0 %v48_v1  ;;  %vm249_vm4 = vcmask 195584   ;;  %v956_v37 = vshrl.u32 %v281_v36, 7  ;;  %v889_v55 = vmov 1.0   ;;  %v478_v59 = vrot.slane %v933_v5, 1  ;;  %s890_s29 = smov 24   ;;  %s891_s30 = smov 104  }
  0x1e   :  { %730 = vmatprep.subr.mxu0 %v884_v0  ;;  %s892_s7 = smov [#allocation7]  }
  0x1f   :  { %731 = vmatpush3.msra.mxu0 %v47_v2  ;;  %v288_v43 = vsub.s32 0, %v956_v37  ;;  %v285_v47 = vadd.s32 24, %v956_v37  ;;  %v284_v49 = vadd.s32 16, %v956_v37  ;;  %v464_v53 = vsub.s32 1, %v956_v37  ;;  %s666_s8 = sshll.u32 %s892_s7, 4  ;;  %s667_s8 = int_to_ptr.vmem [resolvable:$true] %s666_s8 }
  0x20   :  { %732 = vmatprep.subr.mxu0 %v884_v0  ;;  %v968_v54 = vadd.s32 8, %v956_v37  ;;  %s854_s9 = scalar_lea.vmem %s667_s8, 32  ;;  %p859_p11 = scmp.lt.s32.totalorder %s667_s8, %s667_s8 }
  0x21   :  { %733 = vmatpush3.msra.mxu0 %v46_v3  ;;  %p855_p10 = scmp.ne.s32.totalorder %s667_s8, %s854_s9  ;;  %p860_p12 = scmp.lt.s32.totalorder %s854_s9, %s854_s9 }
  0x22   :  { %734 = vmatprep.subr.mxu0 %v884_v0 }
  0x23   :  { %735 = vmatpush3.msra.mxu0 %v45_v4  ;;  %p861_p13 = por %p860_p12, %p859_p11 }
  0x24   :  { %737 = vmatmul.mubr.msk.f32.vlgmr.msra.gmra.mxu0 %vm56_vm1, %v933_v5  ;;  %750 = vmatprep.subr.mxu0 %v884_v0 }
  0x25   :  { %754 = vmatprep.mubr.msk.f32.mxu0 %vm885_vm0, %v884_v0  ;;  %p862_p0 = pnand %p861_p13, %p855_p10 }
  0xe4   :  { %v126_v7 = vpop.f32.mrf.mxu0 }
  0xe5   :  { %v944_v8 = vadd.f32 %v676_v6, %v126_v7 }
  0xe6   :  { %v738_v9 = vpop.f32.mrf.mxu0 }
  0xe7   :  { %v130_v10 = vsub.f32 0.0, %v944_v8  ;;  %v138_v11 = vadd.f32 2.0, %v944_v8 }
  0xe9   :  { %v131_v12 = vmul.f32 1.442695, %v130_v10  ;;  %v140_v13 = vand.u32 2147483647, %v138_v11  ;;  %v139_v24 = vmax.f32 %v138_v11, 0.0 }
  0xeb   :  { %792 = vpow2.f32 %v131_v12  ;;  %v141_v14 = vsub.f32 0.0, %v140_v13 }
  0xed   :  { %v142_v15 = vmul.f32 1.442695, %v141_v14 }
  0xef   :  { %794 = vpow2.f32 %v142_v15 }
  0xf8   :  { %v793_v16 = vpop.eup %792 }
  0xf9   :  { %v133_v17 = vadd.f32 1.0, %v793_v16 }
  0xfb   :  { %796 = vrcp.f32 %v133_v17 }
  0xfc   :  { %v795_v18 = vpop.eup %794 }
  0xfd   :  { %v144_v19 = vadd.f32 1.0, %v795_v18 }
  0xff   :  { %798 = vlog2.f32 %v144_v19 }
 0x108   :  { %v948_v20 = vpop.eup %796 }
 0x109   :  { %v137_v21 = vmul.f32 31.0, %v948_v20  ;;  %v136_v61 = vmul.f32 15.0, %v948_v20 }
 0x10b   :  { %v153_v22 = vfloor.f32 %v137_v21  ;;  %v154_v27 = vceil.f32 %v137_v21  ;;  %v992_v62 = vfloor.f32 %v136_v61  ;;  %v152_v63 = vceil.f32 %v136_v61 }
 0x10c   :  { %v799_v23 = vpop.eup %798 }
 0x10d   :  { %270 = vrot.lane.b32.xlu1 %v153_v22, %s883_s24  ;;  %v146_v25 = vmul.f32 0.6931472, %v799_v23  ;;  %v167_v26 = vsub.f32 %v153_v22, %v137_v21  ;;  %v176_v45 = vsub.f32 %v154_v27, %v137_v21  ;;  %v155_v1 = vsub.f32 %v992_v62, %v136_v61 }
 0x10e   :  { %v164_v2 = vsub.f32 %v152_v63, %v136_v61 }
 0x10f   :  { %v147_v28 = vadd.f32 %v146_v25, %v139_v24  ;;  %v177_v50 = vmul.f32 %v176_v45, %v176_v45  ;;  %v168_v51 = vmul.f32 %v167_v26, %v167_v26  ;;  %v156_v4 = vmul.f32 %v155_v1, %v155_v1 }
 0x111   :  { %274 = vrot.lane.b32.xlu1 %v154_v27, %s886_s2  ;;  %v148_v29 = vadd.f32 1e-06, %v147_v28 }
 0x113   :  { %v150_v30 = vmul.f32 32.0, %v148_v29  ;;  %v149_v32 = vmul.f32 16.0, %v148_v29 }
 0x115   :  { %v169_v31 = vadd.f32 1e-06, %v150_v30  ;;  %v157_v33 = vadd.f32 1e-06, %v149_v32 }
 0x117   :  { %171 = vrot.lane.b32.xlu0 %v169_v31, %s887_s27 }
 0x11b   :  { %267 = vrot.lane.b32.xlu0 %v153_v22, %s887_s27 }
 0x11f   :  { %159 = vrot.lane.b32.xlu0 %v157_v33, %s888_s28 }
 0x17f   :  { %v271_v34 = vpop.permute.xlu1 %270 }
 0x183   :  { %v275_v40 = vpop.permute.xlu1 %274 }
 0x189   :  { %v172_v35 = vpop.permute.xlu0 %171 }
 0x18a   :  { %800 = vrcp.f32 %v172_v35 }
 0x18d   :  { %v268_v38 = vpop.permute.xlu0 %267 }
 0x18e   :  { %v277_v39 = vsel %vm245_vm2, %v268_v38, %v154_v27 }
 0x18f   :  { %v278_v41 = vsel %vm247_vm3, %v277_v39, %v271_v34 }
 0x190   :  { %v279_v42 = vsel %vm249_vm4, %v278_v41, %v275_v40 }
 0x191   :  { %v777_v44 = vtrunc.f32 %v279_v42  ;;  %v160_v60 = vpop.permute.xlu0 %159 }
 0x192   :  { %802 = vrcp.f32 %v160_v60 }
 0x193   :  { %v778_v46 = vcvt.f32.s32 %v777_v44 }
 0x195   :  { %v289_v48 = vrot.slane %v778_v46, %v288_v43  ;;  %v465_v58 = vrot.slane %v778_v46, %v464_v53 }
 0x197   :  { %v801_v52 = vpop.eup %800  ;;  %vm293_vm5 = vcmp.eq.s32.totalorder %v285_v47, %v289_v48  ;;  %vm292_vm6 = vcmp.eq.s32.totalorder %v284_v49, %v289_v48  ;;  %vm291_vm7 = vcmp.eq.s32.totalorder %v968_v54, %v289_v48  ;;  %vm290_vm8 = vcmp.eq.s32.totalorder %v956_v37, %v289_v48 }
 0x198   :  { %740 = vmatpush3.msk.msra.mxu1 %vm293_vm5, %v889_v55  ;;  %v178_v56 = vmul.f32 %v801_v52, %v177_v50  ;;  %v175_v57 = vmul.f32 %v801_v52, %v168_v51  ;;  %vm469_vm9 = vcmp.eq.s32.totalorder %v285_v47, %v465_v58  ;;  %vm468_vm10 = vcmp.eq.s32.totalorder %v284_v49, %v465_v58 }
 0x199   :  { %741 = vmatprep.subr.mxu1 %v884_v0  ;;  %vm467_vm11 = vcmp.eq.s32.totalorder %v968_v54, %v465_v58  ;;  %vm466_vm12 = vcmp.eq.s32.totalorder %v956_v37, %v465_v58 }
 0x19a   :  { %188 = vrot.lane.b32.xlu0 %v178_v56, %s887_s27  ;;  %742 = vmatpush3.msk.msra.mxu1 %vm292_vm6, %v889_v55 }
 0x19b   :  { %180 = vrot.lane.b32.xlu1 %v175_v57, %s887_s27  ;;  %743 = vmatprep.subr.mxu1 %v884_v0 }
 0x19c   :  { %744 = vmatpush3.msk.msra.mxu1 %vm291_vm7, %v889_v55 }
 0x19d   :  { %745 = vmatprep.subr.mxu1 %v884_v0 }
 0x19e   :  { %746 = vmatpush3.msk.msra.mxu1 %vm290_vm8, %v889_v55 }
 0x19f   :  { %757 = vmatprep.subr.mxu1 %v884_v0  ;;  %748 = vmatmul.mubr.msk.f32.vlgmr.msra.gmra.mxu1 %vm56_vm1, %v933_v5  ;;  %v803_v3 = vpop.eup %802  ;;  %v165_v5 = vmul.f32 %v164_v2, %v164_v2 }
 0x1a0   :  { %758 = vmatpush3.msk.msra.mxu1 %vm469_vm9, %v889_v55  ;;  %765 = vmatprep.mubr.msk.f32.mxu1 %vm885_vm0, %v884_v0  ;;  %v163_v6 = vmul.f32 %v803_v3, %v156_v4 }
 0x1a1   :  { %759 = vmatprep.subr.mxu1 %v884_v0  ;;  %v166_v7 = vmul.f32 %v803_v3, %v165_v5 }
 0x1a2   :  { %760 = vmatpush3.msk.msra.mxu1 %vm468_vm10, %v889_v55 }
 0x1a3   :  { %761 = vmatprep.subr.mxu1 %v884_v0 }
 0x1a4   :  { %762 = vmatpush3.msk.msra.mxu1 %vm467_vm11, %v889_v55 }
 0x1a5   :  { %763 = vmatprep.subr.mxu1 %v884_v0 }
 0x1a6   :  { %764 = vmatpush3.msk.msra.mxu1 %vm466_vm12, %v889_v55 }
 0x1a7   :  { %766 = vmatmul.mubr.msk.f32.vlgmr.msra.gmra.mxu1 %vm56_vm1, %v478_v59 }
 0x20c   :  { %v189_v9 = vpop.permute.xlu0 %188 }
 0x20d   :  { %v191_v10 = vadd.f32 %v189_v9, %v163_v6  ;;  %v199_v11 = vadd.f32 %v189_v9, %v166_v7  ;;  %v181_v12 = vpop.permute.xlu1 %180 }
 0x20e   :  { %v183_v13 = vadd.f32 %v181_v12, %v163_v6  ;;  %v195_v14 = vadd.f32 %v181_v12, %v166_v7 }
 0x20f   :  { %v192_v15 = vmul.f32 -0.5, %v191_v10  ;;  %v200_v19 = vmul.f32 -0.5, %v199_v11 }
 0x210   :  { %v184_v16 = vmul.f32 -0.5, %v183_v13  ;;  %v196_v17 = vmul.f32 -0.5, %v195_v14 }
 0x211   :  { %v193_v18 = vmul.f32 1.442695, %v192_v15  ;;  %v201_v22 = vmul.f32 1.442695, %v200_v19 }
 0x212   :  { %v185_v20 = vmul.f32 1.442695, %v184_v16  ;;  %v197_v21 = vmul.f32 1.442695, %v196_v17 }
 0x213   :  { %804 = vpow2.f32 %v193_v18 }
 0x214   :  { %806 = vpow2.f32 %v185_v20 }
 0x215   :  { %808 = vpow2.f32 %v197_v21 }
 0x216   :  { %810 = vpow2.f32 %v201_v22 }
 0x220   :  { %v805_v23 = vpop.eup %804 }
 0x221   :  { %v807_v24 = vpop.eup %806 }
 0x222   :  { %v203_v25 = vadd.f32 %v807_v24, %v805_v23  ;;  %214 = vrot.lane.b32.xlu0 %v807_v24, %s890_s29  ;;  %v809_v26 = vpop.eup %808 }
 0x223   :  { %v811_v28 = vpop.eup %810 }
 0x224   :  { %v204_v27 = vadd.f32 %v809_v26, %v203_v25 }
 0x226   :  { %v205_v29 = vadd.f32 %v811_v28, %v204_v27  ;;  %224 = vrot.lane.b32.xlu0 %v809_v26, %s890_s29 }
 0x228   :  { %v206_v30 = vadd.f32 4e-06, %v205_v29 }
 0x22a   :  { %812 = vrcp.f32 %v206_v30  ;;  %256 = vrot.lane.b32.xlu0 %v152_v63, %s886_s2 }
 0x22e   :  { %229 = vrot.lane.b32.xlu0 %v811_v28, %s890_s29 }
 0x237   :  { %v813_v31 = vpop.eup %812 }
 0x238   :  { %209 = vrot.lane.b32.xlu1 %v813_v31, %s890_s29 }
 0x23c   :  { %219 = vrot.lane.b32.xlu1 %v805_v23, %s890_s29 }
 0x240   :  { %252 = vrot.lane.b32.xlu1 %v992_v62, %s883_s24 }
 0x244   :  { %259 = vrot.lane.b32.xlu1 %v152_v63, %s890_s29 }
 0x25f   :  { %v368_v32 = vpop.f32.mrf.mxu1 }
 0x261   :  { %v749_v33 = vpop.f32.mrf.mxu1 }
 0x267   :  { %v547_v34 = vpop.f32.mrf.mxu1 }
 0x269   :  { %v767_v35 = vpop.f32.mrf.mxu1 }
 0x294   :  { %v215_v36 = vpop.permute.xlu0 %214 }
 0x298   :  { %v225_v42 = vpop.permute.xlu0 %224 }
 0x29c   :  { %v257_v48 = vpop.permute.xlu0 %256 }
 0x2a0   :  { %v230_v58 = vpop.permute.xlu0 %229 }
 0x2aa   :  { %v210_v38 = vpop.permute.xlu1 %209 }
 0x2ab   :  { %v212_v39 = vmul.f32 %v210_v38, %v944_v8 }
 0x2ad   :  { %v217_v40 = vmul.f32 %v215_v36, %v212_v39  ;;  %v227_v45 = vmul.f32 %v225_v42, %v212_v39  ;;  %v232_v63 = vmul.f32 %v230_v58, %v212_v39 }
 0x2ae   :  { %v220_v41 = vpop.permute.xlu1 %219 }
 0x2af   :  { %v222_v44 = vmul.f32 %v220_v41, %v212_v39  ;;  %234 = vrot.lane.b32.xlu1 %v217_v40, %s891_s30 }
 0x2b1   :  { %238 = vrot.lane.b32.xlu0 %v222_v44, %s888_s28 }
 0x2b2   :  { %v253_v46 = vpop.permute.xlu1 %252 }
 0x2b3   :  { %v262_v47 = vsel %vm245_vm2, %v992_v62, %v253_v46  ;;  %242 = vrot.lane.b32.xlu1 %v227_v45, %s887_s27  ;;  %v562_v62 = vrot.slane %v547_v34, 7 }
 0x2b4   :  { %v263_v49 = vsel %vm247_vm3, %v262_v47, %v257_v48 }
 0x2b6   :  { %v260_v50 = vpop.permute.xlu1 %259 }
 0x2b7   :  { %v264_v8 = vsel %vm249_vm4, %v263_v49, %v260_v50 }
 0x2b8   :  { %v775_v51 = vtrunc.f32 %v264_v8 }
 0x2ba   :  { %v776_v52 = vcvt.f32.s32 %v775_v51 }
 0x2bc   :  { %v375_v55 = vrot.slane %v776_v52, %v288_v43  ;;  %v554_v43 = vrot.slane %v776_v52, %v464_v53 }
 0x2be   :  { %vm377_vm13 = vcmp.eq.s32.totalorder %v968_v54, %v375_v55  ;;  %vm376_vm14 = vcmp.eq.s32.totalorder %v956_v37, %v375_v55  ;;  %vm556_vm15 = vcmp.eq.s32.totalorder %v968_v54, %v554_v43  ;;  %vm555_vm5 = vcmp.eq.s32.totalorder %v956_v37, %v554_v43  ;;  %v706_v37 = vld [vmem:[%s1040_s3] ss:$0 sm:$0xff] }
 0x2bf   :  { %v688_v56 = vsel %vm377_vm13, 1.0, %v884_v0  ;;  %v687_v57 = vsel %vm376_vm14, 1.0, %v884_v0  ;;  %v702_v6 = vsel %vm556_vm15, 1.0, %v884_v0  ;;  %v701_v53 = vsel %vm555_vm5, 1.0, %v884_v0 }
 0x2c0   :  { %751 = vmatpush3.xpose.msk.msra.mxu0 %vm56_vm1, %v688_v56 }
 0x2c1   :  { %752 = vmatprep.subr.mxu0 %v884_v0 }
 0x2c4   :  { %753 = vmatpush3.xpose.msk.msra.mxu0 %vm56_vm1, %v687_v57 }
 0x2c5   :  { %768 = vmatprep.subr.mxu0 %v884_v0 }
 0x321   :  { %v235_v59 = vpop.permute.xlu1 %234 }
 0x323   :  { %v239_v60 = vpop.permute.xlu0 %238 }
 0x324   :  { %v246_v61 = vsel %vm245_vm2, %v235_v59, %v239_v60  ;;  %vm648_vm2 = vcmask 1040384  }
 0x325   :  { %v243_v1 = vpop.permute.xlu1 %242 }
 0x326   :  { %v248_v2 = vsel %vm247_vm3, %v246_v61, %v243_v1 }
 0x327   :  { %v250_v3 = vsel %vm249_vm4, %v248_v2, %v232_v63 }
 0x328   :  { %v382_v4 = vmul.f32 %v368_v32, %v250_v3  ;;  %v564_v5 = vmul.f32 %v562_v62, %v250_v3 }
 0x32a   :  { %755 = vmatmul.mubr.msk.f32.vlgmr.msra.gmra.mxu0 %vm56_vm1, %v382_v4  ;;  %v566_v54 = vrot.slane %v564_v5, 1 }
 0x32b   :  { %769 = vmatpush3.xpose.msk.msra.mxu0 %vm56_vm1, %v702_v6  ;;  %772 = vmatprep.mubr.msk.f32.mxu0 %vm885_vm0, %v884_v0  ;;  %vm658_vm0 = vcmask 123904  }
 0x32c   :  { %770 = vmatprep.subr.mxu0 %v884_v0 }
 0x32f   :  { %771 = vmatpush3.xpose.msk.msra.mxu0 %vm56_vm1, %v701_v53 }
 0x332   :  { %773 = vmatmul.mubr.msk.f32.vlgmr.msra.gmra.mxu0 %vm56_vm1, %v566_v54 }
 0x3ea   :  { %v458_v7 = vpop.f32.mrf.mxu0 }
 0x3ec   :  { %v756_v9 = vpop.f32.mrf.mxu0 }
 0x3f2   :  { %v641_v10 = vpop.f32.mrf.mxu0 }
 0x3f3   :  { %v646_v11 = vrot.slane %v641_v10, 7 }
 0x3f4   :  { %v774_v12 = vpop.f32.mrf.mxu0 }
 0x3f5   :  { %v649_v13 = vsel %vm648_vm2, %v458_v7, %v646_v11 }
 0x3f6   :  { %v657_v0 = vadd.f32 %v706_v37, %v649_v13 }
 0x3f8   :  { %659 = vst.msk [vmem:[#allocation7] sm:$0x3] %vm658_vm0, %v657_v0 }
 0x3f9   :  { %865 = shalt.err (!%p862_p0)
}
 0x3fa   :  { %669 = dma.vmem_to_hbm [thread:$0]  %s667_s8, 32, %s1041_s4, [#allocation4]  }
 0x3fb   :  { %878 = dma.done.wait [#allocation4], 32  }
 0x3fc   :  { %879 = vsyncadd [#allocation4], 4294967264 }
 0x3fd   :  { %673 = vsyncpa [#allocation3], 1 }
 0x3fe   :  { %674 = vsyncpa [#allocation6], 1 }
 0x3ff   :  { %675 = vsyncpa [#allocation4], 1 }

</bundles_post_ra>
